<compile_context>
chip_gen: v5e
topology: v5e:2x2
jax: 0.10.0
libtpu: 0.0.40
codegen_flags: <defaults>
</compile_context>

<pallas_src>
import functools
import math

import jax
import jax.numpy as jnp
from jax.experimental import pallas as pl
from jax.experimental.pallas import tpu as pltpu


_LANE = 128
_SUBLANE = 8
# Above this many x+out HBM bytes, force >=2 grid blocks so both v7x
# TensorCores participate (one extra ~0.35 us grid step is noise at this size).
_FORCE_SPLIT_BYTES = 4 * 1024 * 1024


def _build_pe_table_flat(max_seq_len: int, d_model: int) -> jnp.ndarray:
    """Reproduce the PyTorch PE formula exactly, vectorized, pre-flattened.

    pe[pos, j] = sin(pos / 10000**(2*j/d_model)) if j even
                 cos(pos / 10000**(2*j/d_model)) if j odd
    Returned shape (1, max_seq_len * d_model) so the kernel's BlockSpec can
    window it directly (row-major prefix == pe[:S].flatten()); no per-call
    slice/reshape op.
    """
    pos = jnp.arange(max_seq_len, dtype=jnp.float32)[:, None]        # (S_max, 1)
    j = jnp.arange(d_model, dtype=jnp.float32)[None, :]              # (1, D)
    denom = jnp.power(10000.0, 2.0 * j / float(d_model))             # (1, D)
    angle = pos / denom                                              # (S_max, D)
    even_mask = (jnp.arange(d_model) % 2 == 0)[None, :]              # (1, D)
    pe = jnp.where(even_mask, jnp.sin(angle), jnp.cos(angle))
    return pe.astype(jnp.float32).reshape(1, max_seq_len * d_model)


def _pe_kernel(x_ref, pe_ref, o_ref, *, scale):
    # x_ref / o_ref: (Rt, Ct);  pe_ref: (1, Ct) -- broadcasts across rows on the
    # VPU (no in-kernel reshape).  Compute in f32, store in the output dtype.
    x = x_ref[...].astype(jnp.float32)
    pe = pe_ref[...].astype(jnp.float32)
    o_ref[...] = (x * scale + pe).astype(o_ref.dtype)


def _default_vmem_budget():
    """(vmem_limit_bytes, tile_budget_bytes) chosen per TPU generation."""
    try:
        cap = pltpu.get_tpu_info().vmem_capacity_bytes
    except Exception:  # unknown / interpret mode: stay v7x-safe
        cap = 0
    if cap >= 96 * 1024 * 1024:                     # v5e / v6e: 128 MiB VMEM
        return 96 * 1024 * 1024, 64 * 1024 * 1024
    return 48 * 1024 * 1024, 28 * 1024 * 1024       # v7x: 64 MiB VMEM per TC


def _round_up(n: int, m: int) -> int:
    return ((n + m - 1) // m) * m


def _choose_tiles(n_rows, n_cols, x_bytes, out_bytes, pack, budget):
    """Largest (row_tile, col_tile) whose pipelined footprint fits `budget`.

    Cost per pipeline stage (everything double-buffered, sublane padding
    included -- the pe tile is padded to a full 8-sublane f32 tile in VMEM):
        2 * pad(Rt) * Ct * (x_bytes + out_bytes)    # x and out blocks
      + 2 * 8 * Ct * 4                              # the (1, Ct) pe block
    """
    def cost(rt, ct):
        rp = _round_up(rt, pack)
        return 2 * rp * ct * (x_bytes + out_bytes) + 2 * _SUBLANE * ct * 4

    total_hbm_bytes = n_rows * n_cols * (x_bytes + out_bytes)

    # 1) Everything fits in a single block.
    if cost(n_rows, n_cols) <= budget:
        if total_hbm_bytes <= _FORCE_SPLIT_BYTES:
            return n_rows, n_cols
        # Large input: never emit a (1,1) grid -- split so both v7x TCs get
        # work (prefer the column axis, which is the outer grid dimension).
        if n_cols >= 2 * _LANE:
            return n_rows, max(_LANE, (n_cols // 2 // _LANE) * _LANE)
        if n_rows >= 2 * pack:
            return max(pack, (n_rows // 2 // pack) * pack), n_cols
        return n_rows, n_cols

    # 2) Full-width rows fit: tile only the batch/row axis (multiples of the
    #    dtype's sublane pack -> dense stores for bf16/int8 too).
    if n_rows > pack and cost(pack, n_cols) <= budget:
        rt = pack
        while rt * 2 <= n_rows and cost(rt * 2, n_cols) <= budget:
            rt *= 2
        return rt, n_cols

    # 3) Also tile the flattened feature axis (long sequences / large d_model,
    #    esp. on v7x's 64 MiB VMEM).
    rt = n_rows if n_rows < pack else pack
    ct = min(_LANE, n_cols)
    while ct * 2 <= n_cols and cost(rt, ct * 2) <= budget:
        ct *= 2
    return rt, ct


def positional_encoder(x: jnp.ndarray, pe_flat: jnp.ndarray, d_model: int,
                       *, tile_budget_bytes: int | None = None,
                       vmem_limit_bytes: int | None = None) -> jnp.ndarray:
    """x: (B, S, D).  Returns x * sqrt(d_model) + pe[:S]  (dropout = identity).

    pe_flat: (1, S_max*D) table from _build_pe_table_flat (optionally pre-cast
    to x.dtype once by the caller to halve its HBM read bytes).
    """
    B, S, D = x.shape
    assert D == d_model
    SD = S * D
    assert pe_flat.ndim == 2 and pe_flat.shape[0] == 1 and pe_flat.shape[1] >= SD

    if vmem_limit_bytes is None or tile_budget_bytes is None:
        d_limit, d_budget = _default_vmem_budget()
        if vmem_limit_bytes is None:
            vmem_limit_bytes = d_limit
        if tile_budget_bytes is None:
            tile_budget_bytes = d_budget

    scale = math.sqrt(float(d_model))

    # Lane-dense layout: last dim becomes S*D (large multiple of 128 for any
    # realistic S) instead of D, which may be < 128.
    x2 = x.reshape(B, SD)

    pack = max(_SUBLANE, 32 // x.dtype.itemsize)   # 8 f32 / 16 bf16 / 32 int8
    rt, ct = _choose_tiles(B, SD, x.dtype.itemsize, x.dtype.itemsize,
                           pack, tile_budget_bytes)

    # Column blocks outermost, row blocks innermost: the pe block index only
    # depends on the column axis, so across the inner row loop Pallas skips the
    # redundant pe DMA (one pe fetch per column block total).
    grid = (pl.cdiv(SD, ct), pl.cdiv(B, rt))

    kernel = functools.partial(_pe_kernel, scale=scale)
    out2 = pl.pallas_call(
        kernel,
        out_shape=jax.ShapeDtypeStruct((B, SD), x.dtype),
        grid_spec=pltpu.PrefetchScalarGridSpec(
            num_scalar_prefetch=0,
            grid=grid,
            in_specs=[
                pl.BlockSpec((rt, ct), lambda c, r: (r, c)),
                # NOTE: pe could be single-buffered via pipeline_mode=
                # pl.Buffered(1); left at default buffering for maximally
                # portable lowering -- its double-buffered, sublane-padded
                # footprint is already charged in _choose_tiles.
                pl.BlockSpec((1, ct), lambda c, r: (0, c)),
            ],
            out_specs=pl.BlockSpec((rt, ct), lambda c, r: (r, c)),
        ),
        compiler_params=pltpu.CompilerParams(
            dimension_semantics=("parallel", "parallel"),
            vmem_limit_bytes=vmem_limit_bytes,
        ),
    )(x2, pe_flat)
    # TODO(synk): at a real call site, fuse this fma into the adjacent op (or
    # use input_output_aliases={0: 0} with a donated x) to save one full
    # x-sized HBM round-trip.
    return out2.reshape(B, S, D)


if __name__ == "__main__":
    # Small shapes consistent with the module: batch=2, seq=8, d_model=32.
    B, S, D = 2, 8, 32
    max_seq_len = 64

    key = jax.random.PRNGKey(0)
    x = jax.random.normal(key, (B, S, D), dtype=jnp.float32)

    # PE table built (flattened) once and reused across calls -- no per-call
    # slice/reshape of the table.
    pe_flat = _build_pe_table_flat(max_seq_len, D)          # (1, 2048) f32
    pe_2d = pe_flat.reshape(max_seq_len, D)

    scale = math.sqrt(float(D))
    ref_f32 = x * scale + pe_2d[None, :S, :]

    # 1) Default path, float32.
    out = jax.block_until_ready(positional_encoder(x, pe_flat, d_model=D))
    assert out.shape == (B, S, D)
    assert jnp.allclose(out, ref_f32, atol=1e-5, rtol=1e-5), "f32 mismatch vs reference"

    # 2) Force the column-tiled (multi-grid-step) path with a tiny VMEM budget.
    out_tiled = jax.block_until_ready(
        positional_encoder(x, pe_flat, d_model=D, tile_budget_bytes=4096))
    assert jnp.allclose(out_tiled, ref_f32, atol=1e-5, rtol=1e-5), "tiled mismatch vs reference"

    # 3) bf16 activations + pe pre-cast once by the caller (halves pe HBM read
    #    bytes); f32 compute inside the kernel, bf16 store.
    x_bf16 = x.astype(jnp.bfloat16)
    pe_flat_bf16 = pe_flat.astype(jnp.bfloat16)              # cached/hoisted cast
    out_bf16 = jax.block_until_ready(
        positional_encoder(x_bf16, pe_flat_bf16, d_model=D))
    ref_bf16 = (x_bf16.astype(jnp.float32) * scale
                + pe_flat_bf16.reshape(max_seq_len, D)[None, :S, :].astype(jnp.float32)
                ).astype(jnp.bfloat16)
    assert out_bf16.dtype == jnp.bfloat16
    assert jnp.allclose(out_bf16.astype(jnp.float32), ref_bf16.astype(jnp.float32),
                        atol=1e-2, rtol=1e-2), "bf16 mismatch vs reference"

    print("KERNEL_OK")
</pallas_src>

<mosaic_0001>
module attributes {stable_mosaic.version = 11 : i64} {
  func.func @_pe_kernel(%arg0: i32, %arg1: i32, %arg2: memref<2x256xf32, #tpu.memory_space<vmem>>, %arg3: memref<1x256xf32, #tpu.memory_space<vmem>>, %arg4: memref<2x256xf32, #tpu.memory_space<vmem>>) attributes {dimension_semantics = [#tpu.dimension_semantics<parallel>, #tpu.dimension_semantics<parallel>], iteration_bounds = array<i64: 1, 1>, scalar_prefetch = 0 : i64, scratch_operands = 0 : i64, tpu.core_type = #tpu.core_type<tc>, window_params = [{transform_indices = @transform_0, window_bounds = array<i64: 2, 256>}, {transform_indices = @transform_1, window_bounds = array<i64: 1, 256>}, {transform_indices = @transform_2, window_bounds = array<i64: 2, 256>}]} {
    %c0 = arith.constant 0 : index
    %c0_0 = arith.constant 0 : index
    %0 = vector.load %arg2[%c0, %c0_0] : memref<2x256xf32, #tpu.memory_space<vmem>>, vector<2x256xf32>
    %c0_1 = arith.constant 0 : index
    %c0_2 = arith.constant 0 : index
    %1 = vector.load %arg3[%c0_1, %c0_2] : memref<1x256xf32, #tpu.memory_space<vmem>>, vector<1x256xf32>
    %cst = arith.constant 5.65685415 : f32
    %2 = vector.broadcast %cst : f32 to vector<2x256xf32>
    %3 = arith.mulf %0, %2 : vector<2x256xf32>
    %4 = vector.broadcast %1 : vector<1x256xf32> to vector<2x256xf32>
    %5 = arith.addf %3, %4 : vector<2x256xf32>
    %c0_3 = arith.constant 0 : index
    %c0_4 = arith.constant 0 : index
    %6 = vector.load %arg4[%c0_3, %c0_4] : memref<2x256xf32, #tpu.memory_space<vmem>>, vector<2x256xf32>
    tpu.vector_store %arg4[%c0_3, %c0_4], %5 {strides = array<i32>} : memref<2x256xf32, #tpu.memory_space<vmem>>, vector<2x256xf32>,
    return
  }
  func.func @transform_0(%arg0: i32, %arg1: i32) -> (i32, i32) {
    %c0_i32 = arith.constant 0 : i32
    return %arg1, %arg0 : i32, i32
  }
  func.func @transform_1(%arg0: i32, %arg1: i32) -> (i32, i32) {
    %c0_i32 = arith.constant 0 : i32
    %c0_i32_0 = arith.constant 0 : i32
    return %c0_i32, %arg0 : i32, i32
  }
  func.func @transform_2(%arg0: i32, %arg1: i32) -> (i32, i32) {
    %c0_i32 = arith.constant 0 : i32
    return %arg1, %arg0 : i32, i32
  }
}

</mosaic_0001>

<bundles_post_ra>
// kernel: tpu_custom_call.1
= control target key start
LH: loop header
LB: loop body
LE: loop exit
PB: predicated region body
PF: predicated region fallthrough
CT: control target
= control target key end

     0   :  { %7 = vsyncpa [#allocation3], 0  ;;  %s178_s0 = inlined_call_operand.hbm [shape: f32[2,256], index: 0, kind: input, shape index: {}]   ;;  %s179_s1 = inlined_call_operand.hbm [shape: f32[1,2048], index: 1, kind: input, shape index: {}]   ;;  %s180_s2 = inlined_call_operand.hbm [shape: f32[2,256], index: 2, kind: output, shape index: {}]  }
   0x1   :  { %8 = vsyncpa [#allocation6], 0 }
   0x2   :  { %9 = vsyncpa [#allocation4], 0  ;;  %s15_s11 = sshll.u32 %s178_s0, 4  ;;  %s151_s12 = smov [#allocation2]   ;;  %s16_s11 = int_to_ptr.hbm [resolvable:$true] %s15_s11 }
   0x3   :  { %s17_s13 = sshll.u32 %s151_s12, 4  ;;  %s26_s16 = sshll.u32 %s179_s1, 4  ;;  %s18_s13 = int_to_ptr.vmem [resolvable:$true] %s17_s13  ;;  %s27_s16 = int_to_ptr.hbm [resolvable:$true] %s26_s16 }
   0x4   :  { %20 = dma.hbm_to_vmem [thread:$0]  %s16_s11, 64, %s18_s13, [#allocation3]  }
   0x5   :  { %s152_s17 = smov [#allocation5]  }
   0x6   :  { %s28_s18 = sshll.u32 %s152_s17, 4  ;;  %s29_s18 = int_to_ptr.vmem [resolvable:$true] %s28_s18 }
   0x7   :  { %31 = dma.hbm_to_vmem [thread:$0]  %s27_s16, 32, %s29_s18, [#allocation6]  }
   0x8   :  { %145 = dma.done.wait [#allocation3], 64  }
   0x9   :  { %146 = vsyncadd [#allocation3], 4294967232 }
   0xa   :  { %147 = dma.done.wait [#allocation6], 32  }
   0xb   :  { %148 = vsyncadd [#allocation6], 4294967264  ;;  %v40_v0 = vld [vmem:[#allocation2] sm:$0xf]  ;;  %v41_v1 = vld [vmem:[#allocation5] sm:$0x3] }
   0xc   :  { %v44_v2 = vperm.slane %v41_v1, 0  ;;  %v45_v3 = vperm.slane %v41_v1, 1  ;;  %v42_v4 = vmul.f32 5.656854, %v40_v0  ;;  %vm47_vm0 = vcmask 1041408   ;;  %s153_s0 = smov [#allocation7]  }
   0xd   :  { %s57_s19 = sshll.u32 %s153_s0, 4  ;;  %s59_s21 = sshll.u32 %s180_s2, 4  ;;  %s58_s19 = int_to_ptr.vmem [resolvable:$true] %s57_s19  ;;  %s60_s21 = int_to_ptr.hbm [resolvable:$true] %s59_s21 }
   0xe   :  { %v46_v5 = vrot.slane %v45_v3, 6 }
  0x10   :  { %v48_v6 = vsel %vm47_vm0, %v44_v2, %v46_v5 }
  0x11   :  { %v50_v7 = vadd.f32 %v48_v6, %v42_v4 }
  0x13   :  { %51 = vst [vmem:[#allocation7] sm:$0xf] %v50_v7 }
  0x14   :  { %62 = dma.vmem_to_hbm [thread:$0]  %s58_s19, 64, %s60_s21, [#allocation4]  }
  0x15   :  { %149 = dma.done.wait [#allocation4], 64  }
  0x16   :  { %150 = vsyncadd [#allocation4], 4294967232 }
  0x17   :  { %67 = vsyncpa [#allocation3], 1 }
  0x18   :  { %68 = vsyncpa [#allocation6], 1 }
  0x19   :  { %69 = vsyncpa [#allocation4], 1 }

</bundles_post_ra>
